<compile_context>
chip_gen: v7x
topology: tpu7x:2x2x1
jax: 0.10.0
libtpu: 0.0.40
codegen_flags: <defaults>
</compile_context>

<pallas_src>
import jax
import jax.numpy as jnp
import numpy as np
from jax.experimental import pallas as pl
from jax.experimental.pallas import tpu as pltpu

KSIZES = (3, 4, 5)
KMAX = max(KSIZES)      # 5
PMAX = KMAX - 1         # 4 : uniform left zero-padding used by the fused conv
NC_PAD = 128            # lane-dense output width


def _round_up(x, m):
    return (x + m - 1) // m * m


def make_textcnn_kernel(TB, S, D, C3, SP, L):
    def kernel(emb_ref, w_ref, bconv_ref, mask_ref, wfc_ref, bfc_ref,
               out_ref, xpad_ref):
        # Build the zero-padded sequence in a VMEM scratch (no wrapper-side padded
        # HBM copy). Pad strips are rewritten every step so megacore partitioning
        # of the "parallel" axis can never see uninitialized scratch.
        xpad_ref[:, :PMAX, :] = jnp.zeros((TB, PMAX, D), jnp.float32)
        xpad_ref[:, PMAX + S:, :] = jnp.zeros((TB, SP - PMAX - S, D), jnp.float32)
        xpad_ref[:, PMAX:PMAX + S, :] = emb_ref[...]

        # Fused conv over all three branch widths: KMAX shifted matmuls with the
        # batch tile folded into the MXU M dimension. L is a multiple of 8 so the
        # (TB, L, D) -> (TB*L, D) collapse is layout-preserving.
        acc = None
        for dk in range(KMAX):
            x = xpad_ref[:, dk:dk + L, :].reshape(TB * L, D)      # (TB*L, D)
            y = jnp.dot(x, w_ref[dk], preferred_element_type=jnp.float32)
            acc = y if acc is None else acc + y                    # (TB*L, 3C)
        acc = acc.reshape(TB, L, C3)

        # Bias + ReLU, then zero the positions that PyTorch's per-branch padding
        # never produces. Masking to 0 (not -inf) is exact here because ReLU
        # output >= 0 and every branch has at least one valid position.
        acc = jnp.maximum(acc + bconv_ref[...], 0.0) * mask_ref[...]
        pooled = jnp.max(acc, axis=1)                              # (TB, 3C)

        # TODO(synk): dropout(p=0.5) is identity in eval mode; training-mode RNG
        # mask not implemented.
        out_ref[...] = (jnp.dot(pooled, wfc_ref[...],
                                preferred_element_type=jnp.float32)
                        + bfc_ref[...])                            # (TB, 128) unmasked store

    return kernel


def textcnn_forward(tokens, params, *, S, D, C, NC):
    B = tokens.shape[0]
    C3 = 3 * C
    L = _round_up(S + PMAX, 8)      # fused conv output length (sublane aligned)
    SP = L + KMAX - 1               # padded sequence length held in VMEM scratch

    # --- batch tile: amortize the ~0.35us per-grid-step overhead; rough VMEM cap ---
    row_bytes = (S + SP) * D * 4    # input block + scratch bytes per batch row
    tb_cap = max(8, ((8 << 20) // max(row_bytes, 1)) // 8 * 8)
    TB = int(min(128, tb_cap, _round_up(B, 8)))
    B_pad = _round_up(B, TB)
    # NOTE: on v7x (2 TensorCores) prefer B_pad a multiple of 2*TB so both cores get tiles.

    tokens_p = jnp.pad(tokens, ((0, B_pad - B), (0, 0)))
    # Embedding gather stays in XLA (token -> row gather); the kernel then reads the
    # (B, S, D) activations exactly once (padding happens in VMEM inside the kernel).
    # TODO(synk): move the gather in-kernel (VMEM-resident table) to drop this HBM pass.
    emb = params['embedding'][tokens_p].astype(jnp.float32)        # (B_pad, S, D)

    # --- fuse the 3 conv branches into one pre-transposed (KMAX, D, 3C) weight ---
    W = jnp.zeros((KMAX, D, C3), jnp.float32)
    bconv, valid_len = [], []
    for g, k in enumerate(KSIZES):
        wk = jnp.transpose(params[f'w{g + 1}'], (1, 2, 0))         # (k, D, C)
        shift = KMAX - k                                           # = PMAX - (k-1)
        W = W.at[shift:shift + k, :, g * C:(g + 1) * C].set(wk)
        bconv.append(params[f'b{g + 1}'])
        valid_len.append(jnp.full((C,), S + k - 1, jnp.int32))
    bconv = jnp.concatenate(bconv, axis=1)                         # (1, 3C)
    valid_len = jnp.concatenate(valid_len)                         # (3C,)
    mask = (jnp.arange(L, dtype=jnp.int32)[:, None]
            < valid_len[None, :]).astype(jnp.float32)              # (L, 3C)

    # --- FC weights: pre-transposed and lane-padded so the output store is dense ---
    wfc_t = jnp.zeros((C3, NC_PAD), jnp.float32).at[:, :NC].set(params['wfc'].T)
    bfc_p = jnp.zeros((1, NC_PAD), jnp.float32).at[:, :NC].set(params['bfc'])

    kernel = make_textcnn_kernel(TB, S, D, C3, SP, L)
    grid = (B_pad // TB,)

    flops = 2 * B_pad * L * KMAX * D * C3 + 2 * B_pad * C3 * NC_PAD
    bytes_accessed = 4 * (B_pad * S * D + KMAX * D * C3 + L * C3
                          + C3 * NC_PAD + NC_PAD + C3 + B_pad * NC_PAD)

    out = pl.pallas_call(
        kernel,
        out_shape=jax.ShapeDtypeStruct((B_pad, NC_PAD), jnp.float32),
        grid=grid,
        in_specs=[
            pl.BlockSpec((TB, S, D), lambda i: (i, 0, 0)),
            pl.BlockSpec((KMAX, D, C3), lambda i: (0, 0, 0)),
            pl.BlockSpec((1, C3), lambda i: (0, 0)),
            pl.BlockSpec((L, C3), lambda i: (0, 0)),
            pl.BlockSpec((C3, NC_PAD), lambda i: (0, 0)),
            pl.BlockSpec((1, NC_PAD), lambda i: (0, 0)),
        ],
        out_specs=pl.BlockSpec((TB, NC_PAD), lambda i: (i, 0)),
        scratch_shapes=[pltpu.VMEM((TB, SP, D), jnp.float32)],
        compiler_params=pltpu.CompilerParams(
            dimension_semantics=("parallel",)),
        cost_estimate=pl.CostEstimate(flops=flops, transcendentals=0,
                                      bytes_accessed=bytes_accessed),
    )(emb, W, bconv, mask, wfc_t, bfc_p)

    return out[:B, :NC]                                            # (B, NC)


def reference(tokens, params, *, S, D, C, NC):
    """Pure-JAX reference mirroring the PyTorch forward (eval mode)."""
    emb = params['embedding'][tokens]                              # (B, S, D)
    x = emb[:, None, :, :]                                         # (B, 1, S, D) NCHW
    feats = []
    for i, k in enumerate(KSIZES, start=1):
        w = params[f'w{i}'][:, None, :, :]                         # (C, 1, k, D) OIHW
        y = jax.lax.conv_general_dilated(
            x, w, window_strides=(1, 1), padding=((k - 1, k - 1), (0, 0)),
            dimension_numbers=('NCHW', 'OIHW', 'NCHW'))            # (B, C, L, 1)
        y = y + params[f'b{i}'].reshape(1, C, 1, 1)
        y = jax.nn.relu(y[:, :, :, 0])                             # (B, C, L)
        feats.append(jnp.max(y, axis=2))                           # (B, C)
    feat = jnp.concatenate(feats, axis=1)                          # (B, 3C)
    return feat @ params['wfc'].T + params['bfc']                  # (B, NC)


if __name__ == "__main__":
    # Module hyperparameters (in_channels must be 1 for the forward's unsqueeze(1)).
    B, S = 2, 8
    IN_CHANNELS, OUT_CHANNELS = 1, 8
    VOCAB_SIZE, EMBED_DIM, NUM_CLASSES = 16, 32, 4

    key = jax.random.PRNGKey(0)
    ks = jax.random.split(key, 10)
    params = {
        'embedding': jax.random.normal(ks[0], (VOCAB_SIZE, EMBED_DIM), jnp.float32),
        'w1': 0.1 * jax.random.normal(ks[1], (OUT_CHANNELS, 3, EMBED_DIM), jnp.float32),
        'b1': 0.1 * jax.random.normal(ks[2], (1, OUT_CHANNELS), jnp.float32),
        'w2': 0.1 * jax.random.normal(ks[3], (OUT_CHANNELS, 4, EMBED_DIM), jnp.float32),
        'b2': 0.1 * jax.random.normal(ks[4], (1, OUT_CHANNELS), jnp.float32),
        'w3': 0.1 * jax.random.normal(ks[5], (OUT_CHANNELS, 5, EMBED_DIM), jnp.float32),
        'b3': 0.1 * jax.random.normal(ks[6], (1, OUT_CHANNELS), jnp.float32),
        'wfc': 0.1 * jax.random.normal(ks[7], (NUM_CLASSES, 3 * OUT_CHANNELS), jnp.float32),
        'bfc': 0.1 * jax.random.normal(ks[8], (1, NUM_CLASSES), jnp.float32),
    }
    tokens = jax.random.randint(ks[9], (B, S), 0, VOCAB_SIZE, dtype=jnp.int32)

    out = textcnn_forward(tokens, params, S=S, D=EMBED_DIM, C=OUT_CHANNELS, NC=NUM_CLASSES)
    jax.block_until_ready(out)

    ref = reference(tokens, params, S=S, D=EMBED_DIM, C=OUT_CHANNELS, NC=NUM_CLASSES)
    np.testing.assert_allclose(np.asarray(out), np.asarray(ref), rtol=1e-5, atol=1e-5)
    print("KERNEL_OK")
</pallas_src>

<mosaic_0001>
module attributes {stable_mosaic.version = 11 : i64} {
  func.func @kernel(%arg0: i32, %arg1: memref<8x8x32xf32, #tpu.memory_space<vmem>>, %arg2: memref<5x32x24xf32, #tpu.memory_space<vmem>>, %arg3: memref<1x24xf32, #tpu.memory_space<vmem>>, %arg4: memref<16x24xf32, #tpu.memory_space<vmem>>, %arg5: memref<24x128xf32, #tpu.memory_space<vmem>>, %arg6: memref<1x128xf32, #tpu.memory_space<vmem>>, %arg7: memref<8x128xf32, #tpu.memory_space<vmem>>, %arg8: memref<8x20x32xf32, #tpu.memory_space<vmem>>) attributes {dimension_semantics = [#tpu.dimension_semantics<parallel>], iteration_bounds = array<i64: 1>, scalar_prefetch = 0 : i64, scratch_operands = 1 : i64, tpu.core_type = #tpu.core_type<tc>, window_params = [{transform_indices = @transform_0, window_bounds = array<i64: 8, 8, 32>}, {pipeline_mode = #tpu.pipeline_mode<synchronous>, transform_indices = @transform_1, window_bounds = array<i64: 5, 32, 24>}, {pipeline_mode = #tpu.pipeline_mode<synchronous>, transform_indices = @transform_2, window_bounds = array<i64: 1, 24>}, {pipeline_mode = #tpu.pipeline_mode<synchronous>, transform_indices = @transform_3, window_bounds = array<i64: 16, 24>}, {pipeline_mode = #tpu.pipeline_mode<synchronous>, transform_indices = @transform_4, window_bounds = array<i64: 24, 128>}, {pipeline_mode = #tpu.pipeline_mode<synchronous>, transform_indices = @transform_5, window_bounds = array<i64: 1, 128>}, {transform_indices = @transform_6, window_bounds = array<i64: 8, 128>}]} {
    %cst = arith.constant 0.000000e+00 : f32
    %0 = vector.broadcast %cst : f32 to vector<8x4x32xf32>
    %c0 = arith.constant 0 : index
    %c0_0 = arith.constant 0 : index
    %c0_1 = arith.constant 0 : index
    %1 = vector.load %arg8[%c0, %c0_0, %c0_1] : memref<8x20x32xf32, #tpu.memory_space<vmem>>, vector<8x4x32xf32>
    tpu.vector_store %arg8[%c0, %c0_0, %c0_1], %0 {strides = array<i32>} : memref<8x20x32xf32, #tpu.memory_space<vmem>>, vector<8x4x32xf32>,
    %cst_2 = arith.constant 0.000000e+00 : f32
    %2 = vector.broadcast %cst_2 : f32 to vector<8x8x32xf32>
    %c0_3 = arith.constant 0 : index
    %c12 = arith.constant 12 : index
    %c0_4 = arith.constant 0 : index
    %3 = vector.load %arg8[%c0_3, %c12, %c0_4] : memref<8x20x32xf32, #tpu.memory_space<vmem>>, vector<8x8x32xf32>
    tpu.vector_store %arg8[%c0_3, %c12, %c0_4], %2 {strides = array<i32>} : memref<8x20x32xf32, #tpu.memory_space<vmem>>, vector<8x8x32xf32>,
    %c0_5 = arith.constant 0 : index
    %c0_6 = arith.constant 0 : index
    %c0_7 = arith.constant 0 : index
    %4 = vector.load %arg1[%c0_5, %c0_6, %c0_7] : memref<8x8x32xf32, #tpu.memory_space<vmem>>, vector<8x8x32xf32>
    %c0_8 = arith.constant 0 : index
    %c4 = arith.constant 4 : index
    %c0_9 = arith.constant 0 : index
    %5 = vector.load %arg8[%c0_8, %c4, %c0_9] : memref<8x20x32xf32, #tpu.memory_space<vmem>>, vector<8x8x32xf32>
    tpu.vector_store %arg8[%c0_8, %c4, %c0_9], %4 {strides = array<i32>} : memref<8x20x32xf32, #tpu.memory_space<vmem>>, vector<8x8x32xf32>,
    %c0_10 = arith.constant 0 : index
    %c0_11 = arith.constant 0 : index
    %c0_12 = arith.constant 0 : index
    %6 = vector.load %arg8[%c0_10, %c0_11, %c0_12] : memref<8x20x32xf32, #tpu.memory_space<vmem>>, vector<8x16x32xf32>
    %7 = vector.shape_cast %6 : vector<8x16x32xf32> to vector<128x32xf32>
    %c0_13 = arith.constant 0 : index
    %c0_14 = arith.constant 0 : index
    %c0_15 = arith.constant 0 : index
    %8 = vector.load %arg2[%c0_13, %c0_14, %c0_15] : memref<5x32x24xf32, #tpu.memory_space<vmem>>, vector<1x32x24xf32>
    %9 = vector.shape_cast %8 : vector<1x32x24xf32> to vector<32x24xf32>
    %cst_16 = arith.constant dense<0.000000e+00> : vector<128x24xf32>
    %10 = tpu.matmul %7, %9, %cst_16 {dimension_numbers = #tpu.dot_dimension_numbers<[1], [0], [0], [1], [0, 0, 1, 1], [], []>} : vector<128x32xf32>, vector<32x24xf32>, vector<128x24xf32> -> vector<128x24xf32>
    %c0_17 = arith.constant 0 : index
    %c1 = arith.constant 1 : index
    %c0_18 = arith.constant 0 : index
    %11 = vector.load %arg8[%c0_17, %c1, %c0_18] : memref<8x20x32xf32, #tpu.memory_space<vmem>>, vector<8x16x32xf32>
    %12 = vector.shape_cast %11 : vector<8x16x32xf32> to vector<128x32xf32>
    %c1_19 = arith.constant 1 : index
    %c0_20 = arith.constant 0 : index
    %c0_21 = arith.constant 0 : index
    %13 = vector.load %arg2[%c1_19, %c0_20, %c0_21] : memref<5x32x24xf32, #tpu.memory_space<vmem>>, vector<1x32x24xf32>
    %14 = vector.shape_cast %13 : vector<1x32x24xf32> to vector<32x24xf32>
    %cst_22 = arith.constant dense<0.000000e+00> : vector<128x24xf32>
    %15 = tpu.matmul %12, %14, %cst_22 {dimension_numbers = #tpu.dot_dimension_numbers<[1], [0], [0], [1], [0, 0, 1, 1], [], []>} : vector<128x32xf32>, vector<32x24xf32>, vector<128x24xf32> -> vector<128x24xf32>
    %16 = arith.addf %10, %15 : vector<128x24xf32>
    %c0_23 = arith.constant 0 : index
    %c2 = arith.constant 2 : index
    %c0_24 = arith.constant 0 : index
    %17 = vector.load %arg8[%c0_23, %c2, %c0_24] : memref<8x20x32xf32, #tpu.memory_space<vmem>>, vector<8x16x32xf32>
    %18 = vector.shape_cast %17 : vector<8x16x32xf32> to vector<128x32xf32>
    %c2_25 = arith.constant 2 : index
    %c0_26 = arith.constant 0 : index
    %c0_27 = arith.constant 0 : index
    %19 = vector.load %arg2[%c2_25, %c0_26, %c0_27] : memref<5x32x24xf32, #tpu.memory_space<vmem>>, vector<1x32x24xf32>
    %20 = vector.shape_cast %19 : vector<1x32x24xf32> to vector<32x24xf32>
    %cst_28 = arith.constant dense<0.000000e+00> : vector<128x24xf32>
    %21 = tpu.matmul %18, %20, %cst_28 {dimension_numbers = #tpu.dot_dimension_numbers<[1], [0], [0], [1], [0, 0, 1, 1], [], []>} : vector<128x32xf32>, vector<32x24xf32>, vector<128x24xf32> -> vector<128x24xf32>
    %22 = arith.addf %16, %21 : vector<128x24xf32>
    %c0_29 = arith.constant 0 : index
    %c3 = arith.constant 3 : index
    %c0_30 = arith.constant 0 : index
    %23 = vector.load %arg8[%c0_29, %c3, %c0_30] : memref<8x20x32xf32, #tpu.memory_space<vmem>>, vector<8x16x32xf32>
    %24 = vector.shape_cast %23 : vector<8x16x32xf32> to vector<128x32xf32>
    %c3_31 = arith.constant 3 : index
    %c0_32 = arith.constant 0 : index
    %c0_33 = arith.constant 0 : index
    %25 = vector.load %arg2[%c3_31, %c0_32, %c0_33] : memref<5x32x24xf32, #tpu.memory_space<vmem>>, vector<1x32x24xf32>
    %26 = vector.shape_cast %25 : vector<1x32x24xf32> to vector<32x24xf32>
    %cst_34 = arith.constant dense<0.000000e+00> : vector<128x24xf32>
    %27 = tpu.matmul %24, %26, %cst_34 {dimension_numbers = #tpu.dot_dimension_numbers<[1], [0], [0], [1], [0, 0, 1, 1], [], []>} : vector<128x32xf32>, vector<32x24xf32>, vector<128x24xf32> -> vector<128x24xf32>
    %28 = arith.addf %22, %27 : vector<128x24xf32>
    %c0_35 = arith.constant 0 : index
    %c4_36 = arith.constant 4 : index
    %c0_37 = arith.constant 0 : index
    %29 = vector.load %arg8[%c0_35, %c4_36, %c0_37] : memref<8x20x32xf32, #tpu.memory_space<vmem>>, vector<8x16x32xf32>
    %30 = vector.shape_cast %29 : vector<8x16x32xf32> to vector<128x32xf32>
    %c4_38 = arith.constant 4 : index
    %c0_39 = arith.constant 0 : index
    %c0_40 = arith.constant 0 : index
    %31 = vector.load %arg2[%c4_38, %c0_39, %c0_40] : memref<5x32x24xf32, #tpu.memory_space<vmem>>, vector<1x32x24xf32>
    %32 = vector.shape_cast %31 : vector<1x32x24xf32> to vector<32x24xf32>
    %cst_41 = arith.constant dense<0.000000e+00> : vector<128x24xf32>
    %33 = tpu.matmul %30, %32, %cst_41 {dimension_numbers = #tpu.dot_dimension_numbers<[1], [0], [0], [1], [0, 0, 1, 1], [], []>} : vector<128x32xf32>, vector<32x24xf32>, vector<128x24xf32> -> vector<128x24xf32>
    %34 = arith.addf %28, %33 : vector<128x24xf32>
    %35 = vector.shape_cast %34 : vector<128x24xf32> to vector<8x16x24xf32>
    %c0_42 = arith.constant 0 : index
    %c0_43 = arith.constant 0 : index
    %36 = vector.load %arg3[%c0_42, %c0_43] : memref<1x24xf32, #tpu.memory_space<vmem>>, vector<1x24xf32>
    %37 = vector.shape_cast %36 : vector<1x24xf32> to vector<1x1x24xf32>
    %38 = vector.broadcast %37 : vector<1x1x24xf32> to vector<8x16x24xf32>
    %39 = arith.addf %35, %38 : vector<8x16x24xf32>
    %cst_44 = arith.constant 0.000000e+00 : f32
    %40 = vector.broadcast %cst_44 : f32 to vector<8x16x24xf32>
    %41 = arith.maximumf %39, %40 : vector<8x16x24xf32>
    %c0_45 = arith.constant 0 : index
    %c0_46 = arith.constant 0 : index
    %42 = vector.load %arg4[%c0_45, %c0_46] : memref<16x24xf32, #tpu.memory_space<vmem>>, vector<16x24xf32>
    %43 = vector.shape_cast %42 : vector<16x24xf32> to vector<1x16x24xf32>
    %44 = vector.broadcast %43 : vector<1x16x24xf32> to vector<8x16x24xf32>
    %45 = arith.mulf %41, %44 : vector<8x16x24xf32>
    %cst_47 = arith.constant dense<0xFF800000> : vector<8x24xf32>
    %46 = vector.multi_reduction <maximumf>, %45, %cst_47 [1] : vector<8x16x24xf32> to vector<8x24xf32>
    %c0_48 = arith.constant 0 : index
    %c0_49 = arith.constant 0 : index
    %47 = vector.load %arg5[%c0_48, %c0_49] : memref<24x128xf32, #tpu.memory_space<vmem>>, vector<24x128xf32>
    %cst_50 = arith.constant dense<0.000000e+00> : vector<8x128xf32>
    %48 = tpu.matmul %46, %47, %cst_50 {dimension_numbers = #tpu.dot_dimension_numbers<[1], [0], [0], [1], [0, 0, 1, 1], [], []>} : vector<8x24xf32>, vector<24x128xf32>, vector<8x128xf32> -> vector<8x128xf32>
    %c0_51 = arith.constant 0 : index
    %c0_52 = arith.constant 0 : index
    %49 = vector.load %arg6[%c0_51, %c0_52] : memref<1x128xf32, #tpu.memory_space<vmem>>, vector<1x128xf32>
    %50 = vector.broadcast %49 : vector<1x128xf32> to vector<8x128xf32>
    %51 = arith.addf %48, %50 : vector<8x128xf32>
    %c0_53 = arith.constant 0 : index
    %c0_54 = arith.constant 0 : index
    %52 = vector.load %arg7[%c0_53, %c0_54] : memref<8x128xf32, #tpu.memory_space<vmem>>, vector<8x128xf32>
    tpu.vector_store %arg7[%c0_53, %c0_54], %51 {strides = array<i32>} : memref<8x128xf32, #tpu.memory_space<vmem>>, vector<8x128xf32>,
    return
  }
  func.func @transform_0(%arg0: i32) -> (i32, i32, i32) {
    %c0_i32 = arith.constant 0 : i32
    %c0_i32_0 = arith.constant 0 : i32
    %c0_i32_1 = arith.constant 0 : i32
    return %arg0, %c0_i32, %c0_i32_0 : i32, i32, i32
  }
  func.func @transform_1(%arg0: i32) -> (i32, i32, i32) {
    %c0_i32 = arith.constant 0 : i32
    %c0_i32_0 = arith.constant 0 : i32
    %c0_i32_1 = arith.constant 0 : i32
    %c0_i32_2 = arith.constant 0 : i32
    return %c0_i32, %c0_i32_0, %c0_i32_1 : i32, i32, i32
  }
  func.func @transform_2(%arg0: i32) -> (i32, i32) {
    %c0_i32 = arith.constant 0 : i32
    %c0_i32_0 = arith.constant 0 : i32
    %c0_i32_1 = arith.constant 0 : i32
    return %c0_i32, %c0_i32_0 : i32, i32
  }
  func.func @transform_3(%arg0: i32) -> (i32, i32) {
    %c0_i32 = arith.constant 0 : i32
    %c0_i32_0 = arith.constant 0 : i32
    %c0_i32_1 = arith.constant 0 : i32
    return %c0_i32, %c0_i32_0 : i32, i32
  }
  func.func @transform_4(%arg0: i32) -> (i32, i32) {
    %c0_i32 = arith.constant 0 : i32
    %c0_i32_0 = arith.constant 0 : i32
    %c0_i32_1 = arith.constant 0 : i32
    return %c0_i32, %c0_i32_0 : i32, i32
  }
  func.func @transform_5(%arg0: i32) -> (i32, i32) {
    %c0_i32 = arith.constant 0 : i32
    %c0_i32_0 = arith.constant 0 : i32
    %c0_i32_1 = arith.constant 0 : i32
    return %c0_i32, %c0_i32_0 : i32, i32
  }
  func.func @transform_6(%arg0: i32) -> (i32, i32) {
    %c0_i32 = arith.constant 0 : i32
    %c0_i32_0 = arith.constant 0 : i32
    return %arg0, %c0_i32 : i32, i32
  }
}

</mosaic_0001>

<bundles_post_ra>
// kernel: tpu_custom_call.1
= control target key start
LH: loop header
LB: loop body
LE: loop exit
PB: predicated region body
PF: predicated region fallthrough
CT: control target
= control target key end

     0   :  { %vm24_vm0 = vcmask 257024   ;;  %vm33_vm1 = vcmask 261120   ;;  %v1935_v7 = vmov 0.0   ;;  %s2275_s0 = inlined_call_operand.vmem [shape: f32[8,8,32], index: 0, kind: input, shape index: {}]   ;;  %s2276_s1 = inlined_call_operand.vmem [shape: f32[5,32,24], index: 1, kind: input, shape index: {}]   ;;  %s2277_s2 = inlined_call_operand.vmem [shape: f32[1,24], index: 2, kind: input, shape index: {}]   ;;  %s2278_s3 = inlined_call_operand.vmem [shape: f32[16,24], index: 3, kind: input, shape index: {}]   ;;  %s2279_s4 = inlined_call_operand.vmem [shape: f32[24,128], index: 4, kind: input, shape index: {}]   ;;  %s2280_s5 = inlined_call_operand.vmem [shape: f32[1,128], index: 5, kind: input, shape index: {}]   ;;  %s2281_s6 = inlined_call_operand.hbm [shape: f32[8,128], index: 6, kind: output, shape index: {}]  }
   0x1   :  { %v1424_v0 = vld [vmem:[%s2276_s1 + $0x20] sm:$0xff]  ;;  %v1425_v1 = vld [vmem:[%s2276_s1 + $0x28] sm:$0xff]  ;;  %v1426_v5 = vld [vmem:[%s2276_s1 + $0x30] sm:$0xff]  ;;  %25 = vst.msk [vmem:[#allocation2] sm:$0xf] %vm24_vm0, %v1935_v7 }
   0x2   :  { %v1460_v2 = vld [vmem:[%s2276_s1 + $0x40] sm:$0xff]  ;;  %v1796_v3 = vpack.c.bf16 %v1425_v1, %v1424_v0  ;;  %v1461_v4 = vld [vmem:[%s2276_s1 + $0x48] sm:$0xff]  ;;  %v1427_v6 = vld [vmem:[%s2276_s1 + $0x38] sm:$0xff]  ;;  %26 = vst.msk [vmem:[#allocation2 + $0x18] sm:$0xf] %vm24_vm0, %v1935_v7 }
   0x3   :  { %27 = vst.msk [vmem:[#allocation2 + $0x30] sm:$0xf] %vm24_vm0, %v1935_v7  ;;  %28 = vst.msk [vmem:[#allocation2 + $0x48] sm:$0xf] %vm24_vm0, %v1935_v7  ;;  %v2016_v8 = vpack.c.bf16 %v1461_v4, %v1460_v2  ;;  %v1800_v9 = vpack.c.bf16 %v1427_v6, %v1426_v5  ;;  %v1462_v10 = vld [vmem:[%s2276_s1 + $0x50] sm:$0xff]  ;;  %v1463_v11 = vld [vmem:[%s2276_s1 + $0x58] sm:$0xff] }
   0x4   :  { %29 = vst.msk [vmem:[#allocation2 + $0x60] sm:$0xf] %vm24_vm0, %v1935_v7  ;;  %30 = vst.msk [vmem:[#allocation2 + $0x78] sm:$0xf] %vm24_vm0, %v1935_v7  ;;  %v42_v12 = vld [vmem:[%s2275_s0] sm:$0xff]  ;;  %1797 = vmatprep.subr.bf16.mxu1 %v1796_v3  ;;  %v2027_v13 = vpack.c.bf16 %v1463_v11, %v1462_v10  ;;  %v1481_v15 = vld [vmem:[%s2276_s1 + $0x68] sm:$0xff] }
   0x5   :  { %31 = vst.msk [vmem:[#allocation2 + $0x90] sm:$0xf] %vm24_vm0, %v1935_v7  ;;  %32 = vst.msk [vmem:[#allocation2 + $0xa8] sm:$0xf] %vm24_vm0, %v1935_v7  ;;  %v1480_v14 = vld [vmem:[%s2276_s1 + $0x60] sm:$0xff]  ;;  %v43_v16 = vld [vmem:[%s2275_s0 + $0x8] sm:$0xff]  ;;  %1813 = vmatprep.subr.bf16.mxu0 %v2016_v8  ;;  %1799 = vmatpush3.bf16.msra.mxu1 %v1796_v3 }
   0x6   :  { %34 = vst.msk [vmem:[#allocation2 + $0xc] sm:$0xff] %vm33_vm1, %v1935_v7  ;;  %35 = vst.msk [vmem:[#allocation2 + $0x24] sm:$0xff] %vm33_vm1, %v1935_v7  ;;  %v44_v17 = vld [vmem:[%s2275_s0 + $0x10] sm:$0xff]  ;;  %v74_v18 = vld [vmem:[%s2276_s1] sm:$0xff]  ;;  %1815 = vmatpush3.bf16.msra.mxu0 %v2016_v8  ;;  %1801 = vmatprep.subr.bf16.mxu1 %v1800_v9  ;;  %v1820_v22 = vpack.c.bf16 %v1481_v15, %v1480_v14 }
   0x7   :  { %36 = vst.msk [vmem:[#allocation2 + $0x3c] sm:$0xff] %vm33_vm1, %v1935_v7  ;;  %37 = vst.msk [vmem:[#allocation2 + $0x54] sm:$0xff] %vm33_vm1, %v1935_v7  ;;  %v75_v19 = vld [vmem:[%s2276_s1 + $0x8] sm:$0xff]  ;;  %v45_v21 = vld [vmem:[%s2275_s0 + $0x18] sm:$0xff]  ;;  %1817 = vmatprep.subr.bf16.mxu0 %v2027_v13 }
   0x8   :  { %38 = vst.msk [vmem:[#allocation2 + $0x6c] sm:$0xff] %vm33_vm1, %v1935_v7  ;;  %39 = vst.msk [vmem:[#allocation2 + $0x84] sm:$0xff] %vm33_vm1, %v1935_v7  ;;  %v1804_v20 = vpack.c.bf16 %v75_v19, %v74_v18  ;;  %v46_v23 = vld [vmem:[%s2275_s0 + $0x20] sm:$0xff]  ;;  %v47_v24 = vld [vmem:[%s2275_s0 + $0x28] sm:$0xff] }
   0x9   :  { %40 = vst.msk [vmem:[#allocation2 + $0x9c] sm:$0xff] %vm33_vm1, %v1935_v7  ;;  %41 = vst.msk [vmem:[#allocation2 + $0xb4] sm:$0xff] %vm33_vm1, %v1935_v7  ;;  %v1482_v25 = vld [vmem:[%s2276_s1 + $0x70] sm:$0xff]  ;;  %v1483_v26 = vld [vmem:[%s2276_s1 + $0x78] sm:$0xff]  ;;  %1803 = vmatpush3.bf16.msra.mxu1 %v1800_v9 }
   0xa   :  { %50 = vst.msk [vmem:[#allocation2 + $0x4] sm:$0xff] %vm33_vm1, %v42_v12  ;;  %51 = vst.msk [vmem:[#allocation2 + $0x1c] sm:$0xff] %vm33_vm1, %v43_v16  ;;  %v48_v27 = vld [vmem:[%s2275_s0 + $0x30] sm:$0xff]  ;;  %v77_v29 = vld [vmem:[%s2276_s1 + $0x18] sm:$0xff]  ;;  %1819 = vmatpush3.bf16.msra.mxu0 %v2027_v13  ;;  %1805 = vmatprep.subr.bf16.mxu1 %v1804_v20  ;;  %v1824_v37 = vpack.c.bf16 %v1483_v26, %v1482_v25 }
   0xb   :  { %52 = vst.msk [vmem:[#allocation2 + $0x34] sm:$0xff] %vm33_vm1, %v44_v17  ;;  %53 = vst.msk [vmem:[#allocation2 + $0x4c] sm:$0xff] %vm33_vm1, %v45_v21  ;;  %v76_v28 = vld [vmem:[%s2276_s1 + $0x10] sm:$0xff]  ;;  %v49_v30 = vld [vmem:[%s2275_s0 + $0x38] sm:$0xff]  ;;  %1821 = vmatprep.subr.bf16.mxu0 %v1820_v22 }
   0xc   :  { %54 = vst.msk [vmem:[#allocation2 + $0x64] sm:$0xff] %vm33_vm1, %v46_v23  ;;  %55 = vst.msk [vmem:[#allocation2 + $0x7c] sm:$0xff] %vm33_vm1, %v47_v24  ;;  %v1808_v38 = vpack.c.bf16 %v77_v29, %v76_v28  ;;  %v1500_v39 = vld [vmem:[%s2276_s1 + $0x80] sm:$0xff]  ;;  %v1501_v40 = vld [vmem:[%s2276_s1 + $0x88] sm:$0xff] }
   0xd   :  { %56 = vst.msk [vmem:[#allocation2 + $0x94] sm:$0xff] %vm33_vm1, %v48_v27  ;;  %57 = vst.msk [vmem:[#allocation2 + $0xac] sm:$0xff] %vm33_vm1, %v49_v30  ;;  %v1828_v45 = vpack.c.bf16 %v1501_v40, %v1500_v39  ;;  %v1502_v58 = vld [vmem:[%s2276_s1 + $0x90] sm:$0xff]  ;;  %v1503_v59 = vld [vmem:[%s2276_s1 + $0x98] sm:$0xff] }
   0xe   :  { %v1832_v63 = vpack.c.bf16 %v1503_v59, %v1502_v58 }
  0x11   :  { %v78_v31 = vld [vmem:[#allocation2 + $0x1] sm:$0xff]  ;;  %v79_v33 = vld [vmem:[#allocation2 + $0x9] sm:$0xff]  ;;  %v80_v35 = vld [vmem:[#allocation2 + $0x19] sm:$0xff] }
  0x12   :  { %v485_v32 = vld [vmem:[#allocation2 + $0x2] sm:$0xff]  ;;  %1635 = vmatprep.mubr.msk.f32.mxu1 %vm33_vm1, %v78_v31  ;;  %v486_v34 = vld [vmem:[#allocation2 + $0xa] sm:$0xff]  ;;  %v487_v36 = vld [vmem:[#allocation2 + $0x1a] sm:$0xff] }
  0x13   :  { %1699 = vmatprep.mubr.msk.f32.mxu0 %vm33_vm1, %v485_v32  ;;  %1636 = vmatmul.mubr.msk.f32.vlgmr.msra.gmra.mrb[0].mxu1 %vm33_vm1, %v79_v33  ;;  %v81_v41 = vld [vmem:[#allocation2 + $0x21] sm:$0xff]  ;;  %v82_v43 = vld [vmem:[#allocation2 + $0x31] sm:$0xff]  ;;  %v83_v46 = vld [vmem:[#allocation2 + $0x39] sm:$0xff] }
  0x14   :  { %1700 = vmatmul.mubr.msk.f32.vlgmr.msra.gmra.mrb[0].mxu0 %vm33_vm1, %v486_v34  ;;  %1638 = vmatprep.mubr.msk.f32.mxu1 %vm33_vm1, %v80_v35  ;;  %v488_v42 = vld [vmem:[#allocation2 + $0x22] sm:$0xff]  ;;  %v489_v44 = vld [vmem:[#allocation2 + $0x32] sm:$0xff]  ;;  %v490_v47 = vld [vmem:[#allocation2 + $0x3a] sm:$0xff] }
  0x15   :  { %1823 = vmatpush3.bf16.msra.mxu0 %v1820_v22  ;;  %1702 = vmatprep.mubr.msk.f32.mxu0 %vm33_vm1, %v487_v36  ;;  %v84_v48 = vld [vmem:[#allocation2 + $0x49] sm:$0xff]  ;;  %v85_v50 = vld [vmem:[#allocation2 + $0x51] sm:$0xff]  ;;  %v86_v52 = vld [vmem:[#allocation2 + $0x61] sm:$0xff] }
  0x16   :  { %1807 = vmatpush3.bf16.msra.mxu1 %v1804_v20  ;;  %1825 = vmatprep.subr.bf16.mxu0 %v1824_v37  ;;  %v491_v49 = vld [vmem:[#allocation2 + $0x4a] sm:$0xff]  ;;  %v492_v51 = vld [vmem:[#allocation2 + $0x52] sm:$0xff]  ;;  %v493_v53 = vld [vmem:[#allocation2 + $0x62] sm:$0xff] }
  0x17   :  { %1809 = vmatprep.subr.bf16.mxu1 %v1808_v38  ;;  %1639 = vmatmul.mubr.msk.f32.gmra.mrb[2].mxu1 %vm33_vm1, %v81_v41  ;;  %v87_v54 = vld [vmem:[#allocation2 + $0x69] sm:$0xff]  ;;  %v88_v56 = vld [vmem:[#allocation2 + $0x79] sm:$0xff]  ;;  %v89_v60 = vld [vmem:[#allocation2 + $0x81] sm:$0xff] }
  0x18   :  { %1703 = vmatmul.mubr.msk.f32.gmra.mrb[2].mxu0 %vm33_vm1, %v488_v42  ;;  %1641 = vmatprep.mubr.msk.f32.mxu1 %vm33_vm1, %v82_v43  ;;  %v494_v55 = vld [vmem:[#allocation2 + $0x6a] sm:$0xff]  ;;  %v717_v0 = vld [vmem:[#allocation2 + $0x1b] sm:$0xff]  ;;  %v719_v4 = vld [vmem:[#allocation2 + $0x33] sm:$0xff] }
  0x19   :  { %1705 = vmatprep.mubr.msk.f32.mxu0 %vm33_vm1, %v489_v44  ;;  %1827 = vmatpush3.bf16.msra.mxu0 %v1824_v37  ;;  %v715_v57 = vld [vmem:[#allocation2 + $0x3] sm:$0xff]  ;;  %v716_v61 = vld [vmem:[#allocation2 + $0xb] sm:$0xff]  ;;  %v91_v1 = vld [vmem:[#allocation2 + $0x99] sm:$0xff] }
  0x1a   :  { %1811 = vmatpush3.bf16.msra.mxu1 %v1808_v38  ;;  %1829 = vmatprep.subr.bf16.mxu0 %v1828_v45  ;;  %v90_v62 = vld [vmem:[#allocation2 + $0x91] sm:$0xff]  ;;  %v718_v2 = vld [vmem:[#allocation2 + $0x23] sm:$0xff] }
  0x1b   :  { %1839 = vmatprep.subr.bf16.mxu1 %v2016_v8  ;;  %1642 = vmatmul.mubr.msk.f32.gmra.mrb[4].mxu1 %vm33_vm1, %v83_v46  ;;  %v92_v3 = vld [vmem:[#allocation2 + $0xa9] sm:$0xff] }
  0x1c   :  { %1706 = vmatmul.mubr.msk.f32.gmra.mrb[4].mxu0 %vm33_vm1, %v490_v47  ;;  %1644 = vmatprep.mubr.msk.f32.mxu1 %vm33_vm1, %v84_v48 }
  0x1d   :  { %1708 = vmatprep.mubr.msk.f32.mxu0 %vm33_vm1, %v491_v49 }
  0x1f   :  { %1645 = vmatmul.mubr.msk.f32.gmra.mrb[6].mxu1 %vm33_vm1, %v85_v50 }
  0x20   :  { %1709 = vmatmul.mubr.msk.f32.gmra.mrb[6].mxu0 %vm33_vm1, %v492_v51  ;;  %1647 = vmatprep.mubr.msk.f32.mxu1 %vm33_vm1, %v86_v52 }
  0x21   :  { %1711 = vmatprep.mubr.msk.f32.mxu0 %vm33_vm1, %v493_v53 }
  0x23   :  { %1648 = vmatmul.mubr.msk.f32.gmra.mrb[8].mxu1 %vm33_vm1, %v87_v54 }
  0x24   :  { %1712 = vmatmul.mubr.msk.f32.gmra.mrb[8].mxu0 %vm33_vm1, %v494_v55  ;;  %1650 = vmatprep.mubr.msk.f32.mxu1 %vm33_vm1, %v88_v56 }
  0x25   :  { %1731 = vmatprep.mubr.msk.f32.mxu0 %vm33_vm1, %v715_v57 }
  0x27   :  { %1651 = vmatmul.mubr.msk.f32.gmra.mrb[10].mxu1 %vm33_vm1, %v89_v60 }
  0x28   :  { %1732 = vmatmul.mubr.msk.f32.vlgmr.msra.gmra.mrb[0].mxu0 %vm33_vm1, %v716_v61  ;;  %1653 = vmatprep.mubr.msk.f32.mxu1 %vm33_vm1, %v90_v62 }
  0x29   :  { %1831 = vmatpush3.bf16.msra.mxu0 %v1828_v45  ;;  %1734 = vmatprep.mubr.msk.f32.mxu0 %vm33_vm1, %v717_v0 }
  0x2a   :  { %1833 = vmatprep.subr.bf16.mxu0 %v1832_v63 }
  0x2b   :  { %1654 = vmatmul.mubr.msk.f32.gmra.mrb[12].mxu1 %vm33_vm1, %v91_v1 }
  0x2c   :  { %1735 = vmatmul.mubr.msk.f32.gmra.mrb[2].mxu0 %vm33_vm1, %v718_v2 }
  0x2d   :  { %11 = vsyncpa [#allocation4], 0  ;;  %1656 = vmatprep.mubr.msk.f32.mxu1 %vm33_vm1, %v92_v3  ;;  %1737 = vmatprep.mubr.msk.f32.mxu0 %vm33_vm1, %v719_v4  ;;  %v93_v5 = vld [vmem:[#allocation2 + $0xb1] sm:$0xff]  ;;  %v720_v6 = vld [vmem:[#allocation2 + $0x3b] sm:$0xff]  ;;  %v1936_v59 = vmov 0.0|0.0   ;;  %vm1937_vm2 = vmmov 0  }
  0x2e   :  { %v58_v9 = vld [vmem:[#allocation2] sm:$0xff]  ;;  %v721_v10 = vld [vmem:[#allocation2 + $0x4b] sm:$0xff]  ;;  %1835 = vmatpush3.bf16.msra.mxu0 %v1832_v63  ;;  %v722_v12 = vld [vmem:[#allocation2 + $0x53] sm:$0xff]  ;;  %vm1232_vm3 = vcmask 195584   ;;  %vm1323_vm4 = vcmask 1041409   ;;  %vm1325_vm5 = vcmask 1042434  }
  0x2f   :  { %1657 = vmatmul.mubr.msk.f32.gmra.mrb[14].mxu1 %vm33_vm1, %v93_v5  ;;  %v59_v11 = vld [vmem:[#allocation2 + $0x8] sm:$0xff]  ;;  %v60_v14 = vld [vmem:[#allocation2 + $0x18] sm:$0xff]  ;;  %v61_v16 = vld [vmem:[#allocation2 + $0x20] sm:$0xff]  ;;  %vm1327_vm6 = vcmask 1043459   ;;  %vm1329_vm7 = vcmask 1044484   ;;  %vm1331_vm8 = vcmask 1045509  }
  0x30   :  { %1738 = vmatmul.mubr.msk.f32.gmra.mrb[4].mxu0 %vm33_vm1, %v720_v6  ;;  %1667 = vmatprep.mubr.msk.f32.mxu1 %vm33_vm1, %v58_v9  ;;  %v723_v15 = vld [vmem:[#allocation2 + $0x63] sm:$0xff]  ;;  %v724_v17 = vld [vmem:[#allocation2 + $0x6b] sm:$0xff]  ;;  %v725_v19 = vld [vmem:[#allocation2 + $0x7b] sm:$0xff]  ;;  %vm1333_vm9 = vcmask 1046534   ;;  %vm1335_vm10 = vcmask 1047559   ;;  %s1938_s14 = smov [#allocation3]  }
  0x31   :  { %1740 = vmatprep.mubr.msk.f32.mxu0 %vm33_vm1, %v721_v10  ;;  %v62_v18 = vld [vmem:[#allocation2 + $0x30] sm:$0xff]  ;;  %v63_v20 = vld [vmem:[#allocation2 + $0x38] sm:$0xff]  ;;  %v726_v21 = vld [vmem:[#allocation2 + $0x83] sm:$0xff]  ;;  %s1416_s15 = sshll.u32 %s1938_s14, 4  ;;  %s1417_s15 = int_to_ptr.vmem [resolvable:$true] %s1416_s15 }
  0x32   :  { %v64_v22 = vld [vmem:[#allocation2 + $0x48] sm:$0xff]  ;;  %v727_v23 = vld [vmem:[#allocation2 + $0x93] sm:$0xff]  ;;  %v728_v24 = vld [vmem:[#allocation2 + $0x9b] sm:$0xff]  ;;  %s1911_s16 = scalar_lea.vmem %s1417_s15, 128  ;;  %p1916_p1 = scmp.lt.s32.totalorder %s1417_s15, %s1417_s15 }
  0x33   :  { %1668 = vmatmul.mubr.msk.f32.vlgmr.msra.gmra.mrb[0].mxu1 %vm33_vm1, %v59_v11  ;;  %v66_v25 = vld [vmem:[#allocation2 + $0x60] sm:$0xff]  ;;  %v729_v26 = vld [vmem:[#allocation2 + $0xab] sm:$0xff]  ;;  %v730_v27 = vld [vmem:[#allocation2 + $0xb3] sm:$0xff]  ;;  %p1912_p0 = scmp.ne.s32.totalorder %s1417_s15, %s1911_s16  ;;  %p1917_p2 = scmp.lt.s32.totalorder %s1911_s16, %s1911_s16 }
  0x34   :  { %1741 = vmatmul.mubr.msk.f32.gmra.mrb[6].mxu0 %vm33_vm1, %v722_v12  ;;  %1670 = vmatprep.mubr.msk.f32.mxu1 %vm33_vm1, %v60_v14  ;;  %v68_v28 = vld [vmem:[#allocation2 + $0x78] sm:$0xff]  ;;  %v945_v29 = vld [vmem:[#allocation2 + $0x4] sm:$0xff]  ;;  %v946_v31 = vld [vmem:[#allocation2 + $0xc] sm:$0xff] }
  0x35   :  { %1743 = vmatprep.mubr.msk.f32.mxu0 %vm33_vm1, %v723_v15  ;;  %1841 = vmatpush3.bf16.msra.mxu1 %v2016_v8  ;;  %v65_v8 = vld [vmem:[#allocation2 + $0x50] sm:$0xff]  ;;  %v69_v30 = vld [vmem:[#allocation2 + $0x80] sm:$0xff]  ;;  %v71_v34 = vld [vmem:[#allocation2 + $0x98] sm:$0xff]  ;;  %p1918_p3 = por %p1917_p2, %p1916_p1 }
  0x36   :  { %1840 = vmatprep.subr.bf16.mxu1 %v2027_v13  ;;  %v70_v32 = vld [vmem:[#allocation2 + $0x90] sm:$0xff]  ;;  %v947_v33 = vld [vmem:[#allocation2 + $0x1c] sm:$0xff]  ;;  %v948_v35 = vld [vmem:[#allocation2 + $0x24] sm:$0xff] }
  0x37   :  { %1671 = vmatmul.mubr.msk.f32.gmra.mrb[2].mxu1 %vm33_vm1, %v61_v16  ;;  %v72_v36 = vld [vmem:[#allocation2 + $0xa8] sm:$0xff]  ;;  %v949_v37 = vld [vmem:[#allocation2 + $0x34] sm:$0xff]  ;;  %v950_v39 = vld [vmem:[#allocation2 + $0x3c] sm:$0xff]  ;;  %p1919_p4 = pnand %p1918_p3, %p1912_p0 }
  0x38   :  { %1744 = vmatmul.mubr.msk.f32.gmra.mrb[8].mxu0 %vm33_vm1, %v724_v17  ;;  %1673 = vmatprep.mubr.msk.f32.mxu1 %vm33_vm1, %v62_v18  ;;  %v73_v38 = vld [vmem:[#allocation2 + $0xb0] sm:$0xff]  ;;  %v495_v40 = vld [vmem:[#allocation2 + $0x7a] sm:$0xff]  ;;  %v496_v42 = vld [vmem:[#allocation2 + $0x82] sm:$0xff] }
  0x39   :  { %1746 = vmatprep.mubr.msk.f32.mxu0 %vm33_vm1, %v725_v19  ;;  %1842 = vmatpush3.bf16.msra.mxu1 %v2027_v13  ;;  %v67_v13 = vld [vmem:[#allocation2 + $0x68] sm:$0xff]  ;;  %v952_v43 = vld [vmem:[#allocation2 + $0x54] sm:$0xff]  ;;  %v955_v49 = vld [vmem:[#allocation2 + $0x7c] sm:$0xff] }
  0x3a   :  { %v951_v41 = vld [vmem:[#allocation2 + $0x4c] sm:$0xff]  ;;  %v953_v45 = vld [vmem:[#allocation2 + $0x64] sm:$0xff]  ;;  %v498_v46 = vld [vmem:[#allocation2 + $0x9a] sm:$0xff]  ;;  %1836 = vmatprep.subr.bf16.mxu1 %v1936_v59 }
  0x3b   :  { %1674 = vmatmul.mubr.msk.f32.gmra.mrb[4].mxu1 %vm33_vm1, %v63_v20  ;;  %v497_v44 = vld [vmem:[#allocation2 + $0x92] sm:$0xff]  ;;  %v499_v48 = vld [vmem:[#allocation2 + $0xaa] sm:$0xff]  ;;  %v958_v53 = vld [vmem:[#allocation2 + $0x9c] sm:$0xff] }
  0x3c   :  { %1747 = vmatmul.mubr.msk.f32.gmra.mrb[10].mxu0 %vm33_vm1, %v726_v21  ;;  %1676 = vmatprep.mubr.msk.f32.mxu1 %vm33_vm1, %v64_v22  ;;  %v954_v47 = vld [vmem:[#allocation2 + $0x6c] sm:$0xff]  ;;  %v956_v51 = vld [vmem:[#allocation2 + $0x84] sm:$0xff]  ;;  %v957_v52 = vld [vmem:[#allocation2 + $0x94] sm:$0xff] }
  0x3d   :  { %1749 = vmatprep.mubr.msk.f32.mxu0 %vm33_vm1, %v727_v23  ;;  %v500_v50 = vld [vmem:[#allocation2 + $0xb2] sm:$0xff]  ;;  %v1305_v56 = vld [vmem:[%s2279_s4] sm:$0xff]  ;;  %v1306_v57 = vld [vmem:[%s2279_s4 + $0x8] sm:$0xff] }
  0x3e   :  { %v959_v54 = vld [vmem:[#allocation2 + $0xac] sm:$0xff]  ;;  %v960_v55 = vld [vmem:[#allocation2 + $0xb4] sm:$0xff]  ;;  %v1837_v58 = vpack.c.bf16 %v1306_v57, %v1305_v56  ;;  %v2208_v19 = vld [vmem:[%s2278_s3] sm:$0xff] }
  0x3f   :  { %1677 = vmatmul.mubr.msk.f32.gmra.mrb[6].mxu1 %vm33_vm1, %v65_v8  ;;  %v1307_v60 = vld [vmem:[%s2279_s4 + $0x10] sm:$0xff]  ;;  %v2202_v15 = vld [vmem:[%s2278_s3 + $0x8] sm:$0xff] }
  0x40   :  { %1750 = vmatmul.mubr.msk.f32.gmra.mrb[12].mxu0 %vm33_vm1, %v728_v24  ;;  %1679 = vmatprep.mubr.msk.f32.mxu1 %vm33_vm1, %v66_v25 }
  0x41   :  { %1752 = vmatprep.mubr.msk.f32.mxu0 %vm33_vm1, %v729_v26 }
  0x43   :  { %1680 = vmatmul.mubr.msk.f32.gmra.mrb[8].mxu1 %vm33_vm1, %v67_v13 }
  0x44   :  { %1753 = vmatmul.mubr.msk.f32.gmra.mrb[14].mxu0 %vm33_vm1, %v730_v27  ;;  %1682 = vmatprep.mubr.msk.f32.mxu1 %vm33_vm1, %v68_v28 }
  0x45   :  { %1763 = vmatprep.mubr.msk.f32.mxu0 %vm33_vm1, %v945_v29 }
  0x47   :  { %1683 = vmatmul.mubr.msk.f32.gmra.mrb[10].mxu1 %vm33_vm1, %v69_v30 }
  0x48   :  { %1764 = vmatmul.mubr.msk.f32.vlgmr.msra.gmra.mrb[0].mxu0 %vm33_vm1, %v946_v31  ;;  %1685 = vmatprep.mubr.msk.f32.mxu1 %vm33_vm1, %v70_v32 }
  0x49   :  { %1766 = vmatprep.mubr.msk.f32.mxu0 %vm33_vm1, %v947_v33 }
  0x4b   :  { %1686 = vmatmul.mubr.msk.f32.gmra.mrb[12].mxu1 %vm33_vm1, %v71_v34 }
  0x4c   :  { %1767 = vmatmul.mubr.msk.f32.gmra.mrb[2].mxu0 %vm33_vm1, %v948_v35  ;;  %1688 = vmatprep.mubr.msk.f32.mxu1 %vm33_vm1, %v72_v36 }
  0x4d   :  { %1769 = vmatprep.mubr.msk.f32.mxu0 %vm33_vm1, %v949_v37 }
  0x4f   :  { %1689 = vmatmul.mubr.msk.f32.gmra.mrb[14].mxu1 %vm33_vm1, %v73_v38 }
  0x50   :  { %1770 = vmatmul.mubr.msk.f32.gmra.mrb[4].mxu0 %vm33_vm1, %v950_v39  ;;  %1714 = vmatprep.mubr.msk.f32.mxu1 %vm33_vm1, %v495_v40 }
  0x51   :  { %1772 = vmatprep.mubr.msk.f32.mxu0 %vm33_vm1, %v951_v41 }
  0x53   :  { %1715 = vmatmul.mubr.msk.f32.vlgmr.msra.gmra.mrb[10].mxu1 %vm33_vm1, %v496_v42 }
  0x54   :  { %1773 = vmatmul.mubr.msk.f32.gmra.mrb[6].mxu0 %vm33_vm1, %v952_v43  ;;  %1717 = vmatprep.mubr.msk.f32.mxu1 %vm33_vm1, %v497_v44 }
  0x55   :  { %1775 = vmatprep.mubr.msk.f32.mxu0 %vm33_vm1, %v953_v45  ;;  %1838 = vmatpush3.bf16.msra.mxu1 %v1837_v58 }
  0x56   :  { %1791 = vmatprep.subr.mxu1 %v1935_v7 }
  0x57   :  { %1718 = vmatmul.mubr.msk.f32.gmra.mrb[12].mxu1 %vm33_vm1, %v498_v46 }
  0x58   :  { %1776 = vmatmul.mubr.msk.f32.gmra.mrb[8].mxu0 %vm33_vm1, %v954_v47  ;;  %1720 = vmatprep.mubr.msk.f32.mxu1 %vm33_vm1, %v499_v48 }
  0x59   :  { %1778 = vmatprep.mubr.msk.f32.mxu0 %vm33_vm1, %v955_v49  ;;  %1792 = vmatpush3.msra.mxu1 %v1307_v60 }
  0x5b   :  { %1721 = vmatmul.mubr.msk.f32.gmra.mrb[14].mxu1 %vm33_vm1, %v500_v50 }
  0x5c   :  { %1779 = vmatmul.mubr.msk.f32.gmra.mrb[10].mxu0 %vm33_vm1, %v956_v51  ;;  %1793 = vmatprep.mubr.msk.f32.mxu1 %vm1937_vm2, %v1935_v7  ;;  %v2196_v7 = vld [vmem:[%s2277_s2] ss:$0 sm:$0xff] }
  0x5d   :  { %1781 = vmatprep.mubr.msk.f32.mxu0 %vm33_vm1, %v957_v52 }
  0x60   :  { %1782 = vmatmul.mubr.msk.f32.gmra.mrb[12].mxu0 %vm33_vm1, %v958_v53 }
  0x61   :  { %1784 = vmatprep.mubr.msk.f32.mxu0 %vm33_vm1, %v959_v54 }
  0x64   :  { %1785 = vmatmul.mubr.msk.f32.gmra.mrb[14].mxu0 %vm33_vm1, %v960_v55 }
 0x106   :  { %v1669_v61 = vpop.f32.mrb[0].mxu1 }
 0x107   :  { %v406_v62 = vpop.f32.mrb[1].mxu1 }
 0x10a   :  { %v1672_v63 = vpop.f32.mrb[2].mxu1 }
 0x10b   :  { %v416_v0 = vpop.f32.mrb[3].mxu1 }
 0x10e   :  { %v1675_v1 = vpop.f32.mrb[4].mxu1 }
 0x10f   :  { %v426_v2 = vpop.f32.mrb[5].mxu1 }
 0x112   :  { %v1678_v3 = vpop.f32.mrb[6].mxu1 }
 0x113   :  { %v436_v4 = vpop.f32.mrb[7].mxu1 }
 0x116   :  { %v1681_v5 = vpop.f32.mrb[8].mxu1 }
 0x117   :  { %v446_v6 = vpop.f32.mrb[9].mxu1 }
 0x11b   :  { %v1765_v9 = vpop.f32.mrb[0].mxu0 }
 0x11c   :  { %v1843_v10 = vadd.f32 %v1765_v9, %v1669_v61  ;;  %v1080_v11 = vpop.f32.mrb[1].mxu0 }
 0x11d   :  { %v1844_v12 = vadd.f32 %v1080_v11, %v406_v62 }
 0x11e   :  { %v1183_v14 = vadd.f32 %v1843_v10, %v2196_v7 }
 0x11f   :  { %v1182_v16 = vadd.f32 %v1844_v12, %v2196_v7  ;;  %v1768_v17 = vpop.f32.mrb[2].mxu0 }
 0x120   :  { %v1199_v18 = vmax.f32 %v1183_v14, 0.0  ;;  %v1845_v20 = vadd.f32 %v1768_v17, %v1672_v63  ;;  %v1090_v21 = vpop.f32.mrb[3].mxu0 }
 0x121   :  { %v1198_v22 = vmax.f32 %v1182_v16, 0.0  ;;  %v1846_v23 = vadd.f32 %v1090_v21, %v416_v0 }
 0x122   :  { %v1217_v8 = vmul.f32 %v2202_v15, %v1199_v18  ;;  %v1185_v24 = vadd.f32 %v1845_v20, %v2196_v7 }
 0x123   :  { %v1216_v25 = vmul.f32 %v2208_v19, %v1198_v22  ;;  %v1184_v26 = vadd.f32 %v1846_v23, %v2196_v7  ;;  %v1771_v13 = vpop.f32.mrb[4].mxu0 }
 0x124   :  { %v1234_v27 = vsel %vm1232_vm3, %v1217_v8, -inf  ;;  %v1201_v28 = vmax.f32 %v1185_v24, 0.0  ;;  %v1847_v29 = vadd.f32 %v1771_v13, %v1675_v1  ;;  %v1100_v30 = vpop.f32.mrb[5].mxu0 }
 0x125   :  { %v1233_v31 = vsel %vm1232_vm3, %v1216_v25, -inf  ;;  %v1200_v32 = vmax.f32 %v1184_v26, 0.0  ;;  %v1848_v33 = vadd.f32 %v1100_v30, %v426_v2 }
 0x126   :  { %v1235_v34 = vmax.f32 %v1233_v31, %v1234_v27  ;;  %v1219_v35 = vmul.f32 %v2202_v15, %v1201_v28  ;;  %v1187_v36 = vadd.f32 %v1847_v29, %v2196_v7  ;;  %v1716_v39 = vpop.f32.mrb[10].mxu1 }
 0x127   :  { %v1218_v37 = vmul.f32 %v2208_v19, %v1200_v32  ;;  %v1186_v38 = vadd.f32 %v1848_v33, %v2196_v7  ;;  %v1774_v40 = vpop.f32.mrb[6].mxu0  ;;  %v670_v45 = vpop.f32.mrb[11].mxu1 }
 0x128   :  { %v1236_v41 = vrot.slane %v1235_v34, 4  ;;  %v1243_v42 = vsel %vm1232_vm3, %v1219_v35, -inf  ;;  %v1203_v43 = vmax.f32 %v1187_v36, 0.0  ;;  %v1849_v44 = vadd.f32 %v1774_v40, %v1678_v3  ;;  %v1110_v46 = vpop.f32.mrb[7].mxu0 }
 0x129   :  { %v1242_v47 = vsel %vm1232_vm3, %v1218_v37, -inf  ;;  %v1202_v48 = vmax.f32 %v1186_v38, 0.0  ;;  %v1850_v49 = vadd.f32 %v1110_v46, %v436_v4 }
 0x12a   :  { %v1237_v50 = vmax.f32 %v1235_v34, %v1236_v41  ;;  %v1244_v51 = vmax.f32 %v1242_v47, %v1243_v42  ;;  %v1221_v52 = vmul.f32 %v2202_v15, %v1203_v43  ;;  %v1189_v53 = vadd.f32 %v1849_v44, %v2196_v7  ;;  %v1719_v56 = vpop.f32.mrb[12].mxu1 }
 0x12b   :  { %v1220_v54 = vmul.f32 %v2208_v19, %v1202_v48  ;;  %v1188_v55 = vadd.f32 %v1850_v49, %v2196_v7  ;;  %v1777_v57 = vpop.f32.mrb[8].mxu0  ;;  %v680_v62 = vpop.f32.mrb[13].mxu1 }
 0x12c   :  { %v1238_v58 = vrot.slane %v1237_v50, 2  ;;  %v1245_v59 = vrot.slane %v1244_v51, 4  ;;  %v1252_v60 = vsel %vm1232_vm3, %v1221_v52, -inf  ;;  %v1205_v61 = vmax.f32 %v1189_v53, 0.0  ;;  %v1120_v63 = vpop.f32.mrb[9].mxu0 }
 0x12d   :  { %v1251_v0 = vsel %vm1232_vm3, %v1220_v54, -inf  ;;  %v1204_v1 = vmax.f32 %v1188_v55, 0.0  ;;  %v1851_v2 = vadd.f32 %v1777_v57, %v1681_v5  ;;  %v1852_v3 = vadd.f32 %v1120_v63, %v446_v6 }
 0x12e   :  { %v1239_v4 = vmax.f32 %v1237_v50, %v1238_v58  ;;  %v1246_v9 = vmax.f32 %v1244_v51, %v1245_v59  ;;  %v1253_v10 = vmax.f32 %v1251_v0, %v1252_v60  ;;  %v1223_v11 = vmul.f32 %v2202_v15, %v1205_v61  ;;  %v1722_v17 = vpop.f32.mrb[14].mxu1 }
 0x12f   :  { %v1222_v12 = vmul.f32 %v2208_v19, %v1204_v1  ;;  %v1191_v14 = vadd.f32 %v1851_v2, %v2196_v7  ;;  %v1190_v16 = vadd.f32 %v1852_v3, %v2196_v7  ;;  %v1780_v18 = vpop.f32.mrb[10].mxu0  ;;  %v690_v6 = vpop.f32.mrb[15].mxu1 }
 0x130   :  { %v1240_v20 = vrot.slane %v1239_v4, 1  ;;  %v1247_v21 = vrot.slane %v1246_v9, 2  ;;  %v1254_v22 = vrot.slane %v1253_v10, 4  ;;  %v1261_v5 = vsel %vm1232_vm3, %v1223_v11, -inf  ;;  %v1130_v23 = vpop.f32.mrb[11].mxu0 }
 0x131   :  { %v1260_v8 = vsel %vm1232_vm3, %v1222_v12, -inf  ;;  %v1207_v24 = vmax.f32 %v1191_v14, 0.0  ;;  %v1206_v25 = vmax.f32 %v1190_v16, 0.0  ;;  %v1853_v26 = vadd.f32 %v1780_v18, %v1716_v39 }
 0x132   :  { %v1241_v13 = vmax.f32 %v1239_v4, %v1240_v20  ;;  %v1248_v27 = vmax.f32 %v1246_v9, %v1247_v21  ;;  %v1255_v28 = vmax.f32 %v1253_v10, %v1254_v22  ;;  %v1262_v29 = vmax.f32 %v1260_v8, %v1261_v5 }
 0x133   :  { %v1225_v30 = vmul.f32 %v2202_v15, %v1207_v24  ;;  %v1224_v31 = vmul.f32 %v2208_v19, %v1206_v25  ;;  %v1193_v32 = vadd.f32 %v1853_v26, %v2196_v7  ;;  %v1854_v33 = vadd.f32 %v1130_v23, %v670_v45  ;;  %v1783_v34 = vpop.f32.mrb[12].mxu0 }
 0x134   :  { %v1249_v35 = vrot.slane %v1248_v27, 1  ;;  %v1256_v36 = vrot.slane %v1255_v28, 2  ;;  %v1263_v37 = vrot.slane %v1262_v29, 4  ;;  %v1855_v38 = vadd.f32 %v1783_v34, %v1719_v56  ;;  %v1140_v40 = vpop.f32.mrb[13].mxu0 }
 0x135   :  { %v1270_v41 = vsel %vm1232_vm3, %v1225_v30, -inf  ;;  %v1269_v39 = vsel %vm1232_vm3, %v1224_v31, -inf  ;;  %v1209_v42 = vmax.f32 %v1193_v32, 0.0  ;;  %v1192_v43 = vadd.f32 %v1854_v33, %v2196_v7 }
 0x136   :  { %v1250_v44 = vmax.f32 %v1248_v27, %v1249_v35  ;;  %v1257_v46 = vmax.f32 %v1255_v28, %v1256_v36  ;;  %v1264_v47 = vmax.f32 %v1262_v29, %v1263_v37  ;;  %v1271_v48 = vmax.f32 %v1269_v39, %v1270_v41 }
 0x137   :  { %v1227_v45 = vmul.f32 %v2202_v15, %v1209_v42  ;;  %v1208_v49 = vmax.f32 %v1192_v43, 0.0  ;;  %v1195_v50 = vadd.f32 %v1855_v38, %v2196_v7  ;;  %v1856_v51 = vadd.f32 %v1140_v40, %v680_v62  ;;  %v1786_v52 = vpop.f32.mrb[14].mxu0 }
 0x138   :  { %v1324_v53 = vsel %vm1323_vm4, %v1250_v44, %v1241_v13  ;;  %v1258_v54 = vrot.slane %v1257_v46, 1  ;;  %v1265_v55 = vrot.slane %v1264_v47, 2  ;;  %v1272_v56 = vrot.slane %v1271_v48, 4  ;;  %v1150_v57 = vpop.f32.mrb[15].mxu0 }
 0x139   :  { %v1279_v58 = vsel %vm1232_vm3, %v1227_v45, -inf  ;;  %v1226_v59 = vmul.f32 %v2208_v19, %v1208_v49  ;;  %v1211_v60 = vmax.f32 %v1195_v50, 0.0  ;;  %v1194_v61 = vadd.f32 %v1856_v51, %v2196_v7  ;;  %v1521_v50 = vld [vmem:[%s2280_s5] ss:$0 sm:$0xff] }
 0x13a   :  { %v1259_v63 = vmax.f32 %v1257_v46, %v1258_v54  ;;  %v1266_v0 = vmax.f32 %v1264_v47, %v1265_v55  ;;  %v1273_v1 = vmax.f32 %v1271_v48, %v1272_v56  ;;  %v1857_v2 = vadd.f32 %v1786_v52, %v1722_v17 }
 0x13b   :  { %v1278_v62 = vsel %vm1232_vm3, %v1226_v59, -inf  ;;  %v1229_v3 = vmul.f32 %v2202_v15, %v1211_v60  ;;  %v1210_v4 = vmax.f32 %v1194_v61, 0.0  ;;  %v1858_v9 = vadd.f32 %v1150_v57, %v690_v6 }
 0x13c   :  { %v1326_v10 = vsel %vm1325_vm5, %v1259_v63, %v1324_v53  ;;  %v1267_v11 = vrot.slane %v1266_v0, 1  ;;  %v1274_v12 = vrot.slane %v1273_v1, 2  ;;  %v1280_v14 = vmax.f32 %v1278_v62, %v1279_v58 }
 0x13d   :  { %v1288_v16 = vsel %vm1232_vm3, %v1229_v3, -inf  ;;  %v1228_v18 = vmul.f32 %v2208_v19, %v1210_v4  ;;  %v1197_v20 = vadd.f32 %v1857_v2, %v2196_v7  ;;  %v1196_v21 = vadd.f32 %v1858_v9, %v2196_v7 }
 0x13e   :  { %v1268_v17 = vmax.f32 %v1266_v0, %v1267_v11  ;;  %v1275_v22 = vmax.f32 %v1273_v1, %v1274_v12  ;;  %v1281_v5 = vrot.slane %v1280_v14, 4 }
 0x13f   :  { %v1287_v23 = vsel %vm1232_vm3, %v1228_v18, -inf  ;;  %v1213_v8 = vmax.f32 %v1197_v20, 0.0  ;;  %v1212_v6 = vmax.f32 %v1196_v21, 0.0 }
 0x140   :  { %v1276_v24 = vrot.slane %v1275_v22, 1  ;;  %v1282_v25 = vmax.f32 %v1280_v14, %v1281_v5  ;;  %v1289_v26 = vmax.f32 %v1287_v23, %v1288_v16  ;;  %v1328_v13 = vsel %vm1327_vm6, %v1268_v17, %v1326_v10 }
 0x141   :  { %v1231_v27 = vmul.f32 %v2202_v15, %v1213_v8  ;;  %v1230_v28 = vmul.f32 %v2208_v19, %v1212_v6 }
 0x142   :  { %v1277_v29 = vmax.f32 %v1275_v22, %v1276_v24  ;;  %v1283_v30 = vrot.slane %v1282_v25, 2  ;;  %v1290_v7 = vrot.slane %v1289_v26, 4 }
 0x143   :  { %v1297_v31 = vsel %vm1232_vm3, %v1231_v27, -inf  ;;  %v1296_v32 = vsel %vm1232_vm3, %v1230_v28, -inf }
 0x144   :  { %v1284_v33 = vmax.f32 %v1282_v25, %v1283_v30  ;;  %v1291_v34 = vmax.f32 %v1289_v26, %v1290_v7  ;;  %v1298_v35 = vmax.f32 %v1296_v32, %v1297_v31  ;;  %v1330_v36 = vsel %vm1329_vm7, %v1277_v29, %v1328_v13 }
 0x146   :  { %v1285_v37 = vrot.slane %v1284_v33, 1  ;;  %v1292_v38 = vrot.slane %v1291_v34, 2  ;;  %v1299_v40 = vrot.slane %v1298_v35, 4 }
 0x148   :  { %v1286_v41 = vmax.f32 %v1284_v33, %v1285_v37  ;;  %v1293_v15 = vmax.f32 %v1291_v34, %v1292_v38  ;;  %v1300_v39 = vmax.f32 %v1298_v35, %v1299_v40 }
 0x14a   :  { %v1294_v19 = vrot.slane %v1293_v15, 1  ;;  %v1301_v42 = vrot.slane %v1300_v39, 2  ;;  %v1332_v43 = vsel %vm1331_vm8, %v1286_v41, %v1330_v36 }
 0x14c   :  { %v1295_v44 = vmax.f32 %v1293_v15, %v1294_v19  ;;  %v1302_v46 = vmax.f32 %v1300_v39, %v1301_v42 }
 0x14e   :  { %v1303_v47 = vrot.slane %v1302_v46, 1  ;;  %v1334_v48 = vsel %vm1333_vm9, %v1295_v44, %v1332_v43 }
 0x150   :  { %v1304_v45 = vmax.f32 %v1302_v46, %v1303_v47 }
 0x152   :  { %v1336_v49 = vsel %vm1335_vm10, %v1304_v45, %v1334_v48 }
 0x153   :  { %1794 = vmatmul.mubr.msk.f32.vlgmr.msra.gmra.mrb[16].mxu1 %vm1232_vm3, %v1336_v49 }
 0x226   :  { %v1405_v51 = vpop.f32.mrb[16].mxu1 }
 0x227   :  { %v1406_v52 = vadd.f32 %v1521_v50, %v1405_v51  ;;  %v1795_v53 = vpop.f32.mrb[17].mxu1 }
 0x229   :  { %1409 = vst [vmem:[#allocation3] sm:$0xff] %v1406_v52 }
 0x22a   :  { %1922 = shalt.err (!%p1919_p4)
}
 0x22b   :  { %s1923_s19 = scalar_lea.hbm %s2281_s6, 128 }
 0x22c   :  { %p1924_p5 = scmp.ne.s32.totalorder %s2281_s6, %s1923_s19  ;;  %p1927_p6 = scmp.lt.u32.totalorder %s1923_s19, %s2281_s6 }
 0x22e   :  { %p1929_p7 = pnand %p1927_p6, %p1924_p5 }
 0x230   :  { %1932 = shalt.err (!%p1929_p7)
}
 0x231   :  { %1419 = dma.vmem_to_hbm [thread:$0]  %s1417_s15, 128, %s2281_s6, [#allocation4]  }
 0x232   :  { %1933 = dma.done.wait [#allocation4], 128  }
 0x233   :  { %1934 = vsyncadd [#allocation4], 4294967168 }
 0x234   :  { %1423 = vsyncpa [#allocation4], 1 }

</bundles_post_ra>
